<compile_context>
chip_gen: v6e
topology: v6e:2x2x1
jax: 0.10.0
libtpu: 0.0.40
codegen_flags: <defaults>
</compile_context>

<pallas_src>
import functools

import jax
import jax.numpy as jnp
from jax import lax
from jax.experimental import pallas as pl
from jax.experimental.pallas import tpu as pltpu

KH = KW = 3
PAD = 1
EPS = 1e-5


def _make_kernel(tile_h, W, Cin, Cout, matmul_dtype):
    """Kernel for one (batch, H-strip) grid step."""
    thw = tile_h * W                 # output elements per strip (lane dim)
    l_in = (tile_h + 2) * W          # input strip incl. 1-row halo top+bottom
    guard_l = W                      # left guard: only its last element is ever
                                     # read, and that read is masked; a full row
                                     # keeps the activation store row-aligned.
    guard_r = 1                      # right guard: read only by the masked
                                     # (dh=+1, dw=+1) corner tap.

    def kernel(x_ref, scale_ref, shift_ref, w_ref, b_ref, o_ref, ybuf_ref):
        # x_ref:     (1, 1, Cin, (tile_h+2)*W) halo'd input strip, matmul_dtype
        # scale_ref: (Cin, 1)  f32   gamma / sqrt(var + eps)
        # shift_ref: (Cin, 1)  f32   beta - gamma * mean / sqrt(var + eps)
        # w_ref:     (9, Cout, Cin)  conv weight, tap-major, matmul_dtype
        # b_ref:     (Cout, 1) f32   conv bias
        # o_ref:     (1, Cout, tile_h*W) f32 output strip (accumulated in place)
        # ybuf_ref:  (Cin, guard_l + l_in + guard_r) VMEM scratch holding the
        #            post-BN/ReLU strip; guard elements are never-used values
        #            (always masked before entering the MXU).
        t = pl.program_id(1)
        num_t = pl.num_programs(1)

        # ---- folded BatchNorm (f32 promotion) + ReLU, stored once ------------
        y = x_ref[0, 0].astype(jnp.float32) * scale_ref[...] + shift_ref[...]
        y = jnp.maximum(y, 0.0)
        ybuf_ref[:, guard_l:guard_l + l_in] = y.astype(matmul_dtype)

        # Out-of-image halo rows were zero rows *before* BN; re-zero them after
        # BN+ReLU (relu(shift) != 0 in general).  Only the first / last strip
        # of each image has an out-of-image halo row.
        zero_row = jnp.zeros((Cin, W), matmul_dtype)

        @pl.when(t == 0)
        def _():
            ybuf_ref[:, guard_l:guard_l + W] = zero_row

        @pl.when(t == num_t - 1)
        def _():
            ybuf_ref[:, guard_l + (tile_h + 1) * W:guard_l + l_in] = zero_row

        # ---- column-wrap masks, built once at (1, tile_h*W) -------------------
        col = lax.broadcasted_iota(jnp.int32, (1, thw), 1) % W
        mask_l = col >= 1            # dw = -1 invalid at c == 0
        mask_r = col < (W - 1)       # dw = +1 invalid at c == W-1

        # ---- 9 accumulating dots straight into the f32 output block -----------
        o_ref[0] = jnp.broadcast_to(b_ref[...], (Cout, thw))
        for kh in range(KH):
            for kw in range(KW):
                dh, dw = kh - PAD, kw - PAD
                start = guard_l + (dh + 1) * W + dw          # static, >= guard_l - 1
                patch = ybuf_ref[:, start:start + thw]       # (Cin, tile_h*W)
                if dw == -1:
                    patch = jnp.where(mask_l, patch, jnp.zeros((), matmul_dtype))
                elif dw == 1:
                    patch = jnp.where(mask_r, patch, jnp.zeros((), matmul_dtype))
                o_ref[0] += jnp.dot(w_ref[kh * KW + kw], patch,
                                    preferred_element_type=jnp.float32)

    return kernel


def _vmem_bytes(tile_h, W, Cin, Cout, itemsize):
    l_in = (tile_h + 2) * W
    return (2 * Cin * l_in * itemsize                     # input strip blocks (x2 buffers)
            + Cin * (W + l_in + 1) * itemsize             # ybuf scratch
            + 2 * Cout * tile_h * W * 4                   # f32 output blocks (x2 buffers)
            + 2 * (KH * KW * Cout * Cin * itemsize        # weights (x2 buffers)
                   + (2 * Cin + Cout) * 4))               # scale/shift/bias


def _pick_tile_h(H, W, Cin, Cout, itemsize, budget_bytes):
    # Largest strip height that (a) divides H, (b) keeps the output block
    # lane-dense (tile_h*W % 128 == 0, required unless the block spans the whole
    # image), and (c) fits the per-step VMEM budget.  Preferring tile_h < H also
    # gives the pipeline several steps per image to hide DMA behind compute.
    best = None
    for th in range(1, H):
        if H % th:
            continue
        if (th * W) % 128:
            continue
        if _vmem_bytes(th, W, Cin, Cout, itemsize) > budget_bytes:
            continue
        best = th
    return best if best is not None else H


@functools.partial(jax.jit, static_argnames=("matmul_dtype", "tile_h", "vmem_budget_bytes"))
def bn_act_conv(x_nchw, gamma, beta, conv_w, conv_b, *,
                matmul_dtype=jnp.bfloat16, tile_h=None,
                vmem_budget_bytes=10 * 1024 * 1024):
    """BatchNorm2d (training-mode batch stats) -> ReLU -> Conv2d(3x3, s=1, p=1, bias).

    x_nchw: (N, Cin, H, W).  conv_w: (Cout, Cin, 3, 3).  Returns (N, Cout, H, W) f32.
    matmul_dtype: dtype of activations/weights fed to the MXU. bf16 (default)
      halves input HBM traffic; pass jnp.float32 for PyTorch-f32 numerics.
    tile_h: rows per strip (must divide H).  None -> auto-pick the largest strip
      fitting `vmem_budget_bytes` (keep the budget well under physical VMEM:
      64 MiB per core on v7x, 128 MiB on v5e/v6e).
    """
    N, Cin, H, W = x_nchw.shape
    Cout = conv_w.shape[0]
    itemsize = jnp.dtype(matmul_dtype).itemsize

    if tile_h is None:
        tile_h = _pick_tile_h(H, W, Cin, Cout, itemsize, vmem_budget_bytes)
    assert H % tile_h == 0, "tile_h must divide H"
    num_t = H // tile_h
    assert num_t == 1 or (tile_h * W) % 128 == 0, \
        "tile_h*W must be a multiple of 128 when the image is split into strips"
    thw = tile_h * W
    l_in = (tile_h + 2) * W

    # --- BatchNorm training-mode batch stats: two-pass centred form in f32 ------
    x_f32 = x_nchw.astype(jnp.float32)
    mean = jnp.mean(x_f32, axis=(0, 2, 3))
    var = jnp.mean(jnp.square(x_f32 - mean[None, :, None, None]), axis=(0, 2, 3))
    inv_std = lax.rsqrt(var + EPS)
    scale = (gamma * inv_std).reshape(Cin, 1).astype(jnp.float32)
    shift = (beta - gamma * mean * inv_std).reshape(Cin, 1).astype(jnp.float32)

    # --- halo'd input strips: (N, num_t, Cin, (tile_h+2)*W) in matmul_dtype -----
    # The cast (bf16 by default) happens after the f32 stats, so the kernel's
    # input DMA is half-width; the strip gather fuses with the cast under jit.
    x_cast = x_f32.astype(matmul_dtype)
    x_pad = jnp.pad(x_cast, ((0, 0), (0, 0), (1, 1), (0, 0)))   # zero rows top/bottom
    strips = jnp.stack(
        [x_pad[:, :, t * tile_h:t * tile_h + tile_h + 2, :] for t in range(num_t)],
        axis=1).reshape(N, num_t, Cin, l_in)

    # --- conv weight as (9, Cout, Cin), tap-major, matching w_ref[kh*3+kw] ------
    w_taps = jnp.transpose(conv_w, (2, 3, 0, 1)).reshape(KH * KW, Cout, Cin)
    w_taps = w_taps.astype(matmul_dtype)
    bias = conv_b.reshape(Cout, 1).astype(jnp.float32)

    kernel = _make_kernel(tile_h, W, Cin, Cout, matmul_dtype)

    vmem_est = _vmem_bytes(tile_h, W, Cin, Cout, itemsize)
    vmem_limit = int(min(100 * 1024 * 1024, max(32 * 1024 * 1024, 2 * vmem_est)))

    out_flat = pl.pallas_call(
        kernel,
        out_shape=jax.ShapeDtypeStruct((N, Cout, H * W), jnp.float32),
        grid_spec=pltpu.PrefetchScalarGridSpec(
            num_scalar_prefetch=0,
            grid=(N, num_t),
            in_specs=[
                pl.BlockSpec((1, 1, Cin, l_in), lambda n, t: (n, t, 0, 0)),
                pl.BlockSpec((Cin, 1), lambda n, t: (0, 0)),
                pl.BlockSpec((Cin, 1), lambda n, t: (0, 0)),
                pl.BlockSpec((KH * KW, Cout, Cin), lambda n, t: (0, 0, 0)),
                pl.BlockSpec((Cout, 1), lambda n, t: (0, 0)),
            ],
            out_specs=pl.BlockSpec((1, Cout, thw), lambda n, t: (n, 0, t)),
            scratch_shapes=[
                pltpu.VMEM((Cin, W + l_in + 1), matmul_dtype),   # BN/ReLU strip + guards
            ],
        ),
        compiler_params=pltpu.CompilerParams(
            dimension_semantics=("parallel", "parallel"),
            vmem_limit_bytes=vmem_limit),
    )(strips, scale, shift, w_taps, bias)

    # Free metadata reshape back to NCHW.
    return out_flat.reshape(N, Cout, H, W)


def reference(x_nchw, gamma, beta, conv_w, conv_b):
    """Pure-JAX reference mirroring the PyTorch forward (training-mode BN)."""
    mean = jnp.mean(x_nchw, axis=(0, 2, 3), keepdims=True)
    var = jnp.mean(jnp.square(x_nchw - mean), axis=(0, 2, 3), keepdims=True)
    xhat = (x_nchw - mean) / jnp.sqrt(var + EPS)
    y = gamma[None, :, None, None] * xhat + beta[None, :, None, None]
    y = jnp.maximum(y, 0.0)
    out = lax.conv_general_dilated(
        y, conv_w, window_strides=(1, 1), padding=((PAD, PAD), (PAD, PAD)),
        dimension_numbers=("NCHW", "OIHW", "NCHW"),
        precision=lax.Precision.HIGHEST)
    return out + conv_b[None, :, None, None]


if __name__ == "__main__":
    key = jax.random.PRNGKey(0)
    k1, k2, k3, k4, k5 = jax.random.split(key, 5)

    N, Cin, H, W = 2, 4, 16, 16
    Cout = 8

    x = jax.random.normal(k1, (N, Cin, H, W), dtype=jnp.float32)
    gamma = 1.0 + 0.1 * jax.random.normal(k2, (Cin,), dtype=jnp.float32)
    beta = 0.1 * jax.random.normal(k3, (Cin,), dtype=jnp.float32)
    fan_in = Cin * KH * KW
    bound = 1.0 / (fan_in ** 0.5)
    conv_w = jax.random.uniform(k4, (Cout, Cin, KH, KW), jnp.float32, -bound, bound)
    conv_b = jax.random.uniform(k5, (Cout,), jnp.float32, -bound, bound)

    ref = reference(x, gamma, beta, conv_w, conv_b)

    # Exact f32-MXU path, explicitly strip-tiled (2 strips of 8 rows -> exercises
    # the halo / boundary handling): tight structural check.
    out_f32 = jax.block_until_ready(
        bn_act_conv(x, gamma, beta, conv_w, conv_b,
                    matmul_dtype=jnp.float32, tile_h=8))
    assert out_f32.shape == (N, Cout, H, W)
    err_f32 = float(jnp.max(jnp.abs(out_f32 - ref)))
    assert jnp.allclose(out_f32, ref, atol=2e-4, rtol=2e-4), err_f32

    # Default bf16 path with auto-picked strip height (perf configuration).
    # Tolerance covers the bf16 rounding of x and of the post-BN activations
    # (accumulation stays in f32).
    out_bf16 = jax.block_until_ready(bn_act_conv(x, gamma, beta, conv_w, conv_b))
    assert out_bf16.shape == (N, Cout, H, W)
    err_bf16 = float(jnp.max(jnp.abs(out_bf16 - ref)))
    assert jnp.allclose(out_bf16, ref, atol=2e-2, rtol=2e-2), err_bf16

    print("KERNEL_OK")
</pallas_src>

<mosaic_0001>
module attributes {stable_mosaic.version = 11 : i64} {
  func.func @kernel(%arg0: i32, %arg1: i32, %arg2: memref<1x1x4x160xf32, #tpu.memory_space<vmem>>, %arg3: memref<4x1xf32, #tpu.memory_space<vmem>>, %arg4: memref<4x1xf32, #tpu.memory_space<vmem>>, %arg5: memref<9x8x4xf32, #tpu.memory_space<vmem>>, %arg6: memref<8x1xf32, #tpu.memory_space<vmem>>, %arg7: memref<1x8x128xf32, #tpu.memory_space<vmem>>, %arg8: memref<4x177xf32, #tpu.memory_space<vmem>>) attributes {dimension_semantics = [#tpu.dimension_semantics<parallel>, #tpu.dimension_semantics<parallel>], iteration_bounds = array<i64: 2, 2>, scalar_prefetch = 0 : i64, scratch_operands = 1 : i64, tpu.core_type = #tpu.core_type<tc>, window_params = [{transform_indices = @transform_0, window_bounds = array<i64: 1, 1, 4, 160>}, {pipeline_mode = #tpu.pipeline_mode<synchronous>, transform_indices = @transform_1, window_bounds = array<i64: 4, 1>}, {pipeline_mode = #tpu.pipeline_mode<synchronous>, transform_indices = @transform_2, window_bounds = array<i64: 4, 1>}, {pipeline_mode = #tpu.pipeline_mode<synchronous>, transform_indices = @transform_3, window_bounds = array<i64: 9, 8, 4>}, {pipeline_mode = #tpu.pipeline_mode<synchronous>, transform_indices = @transform_4, window_bounds = array<i64: 8, 1>}, {transform_indices = @transform_5, window_bounds = array<i64: 1, 8, 128>}]} {
    %c0 = arith.constant 0 : index
    %c0_0 = arith.constant 0 : index
    %c0_1 = arith.constant 0 : index
    %c0_2 = arith.constant 0 : index
    %0 = vector.load %arg2[%c0, %c0_0, %c0_1, %c0_2] : memref<1x1x4x160xf32, #tpu.memory_space<vmem>>, vector<1x1x4x160xf32>
    %1 = vector.shape_cast %0 : vector<1x1x4x160xf32> to vector<4x160xf32>
    %c0_3 = arith.constant 0 : index
    %c0_4 = arith.constant 0 : index
    %2 = vector.load %arg3[%c0_3, %c0_4] : memref<4x1xf32, #tpu.memory_space<vmem>>, vector<4x1xf32>
    %3 = vector.broadcast %2 : vector<4x1xf32> to vector<4x160xf32>
    %4 = arith.mulf %1, %3 : vector<4x160xf32>
    %c0_5 = arith.constant 0 : index
    %c0_6 = arith.constant 0 : index
    %5 = vector.load %arg4[%c0_5, %c0_6] : memref<4x1xf32, #tpu.memory_space<vmem>>, vector<4x1xf32>
    %6 = vector.broadcast %5 : vector<4x1xf32> to vector<4x160xf32>
    %7 = arith.addf %4, %6 : vector<4x160xf32>
    %cst = arith.constant 0.000000e+00 : f32
    %8 = vector.broadcast %cst : f32 to vector<4x160xf32>
    %9 = arith.maximumf %7, %8 : vector<4x160xf32>
    %c0_7 = arith.constant 0 : index
    %c16 = arith.constant 16 : index
    %10 = vector.load %arg8[%c0_7, %c16] : memref<4x177xf32, #tpu.memory_space<vmem>>, vector<4x160xf32>
    tpu.vector_store %arg8[%c0_7, %c16], %9 {strides = array<i32>} : memref<4x177xf32, #tpu.memory_space<vmem>>, vector<4x160xf32>,
    %cst_8 = arith.constant 0.000000e+00 : f32
    %11 = vector.broadcast %cst_8 : f32 to vector<4x16xf32>
    %c0_i32 = arith.constant 0 : i32
    %12 = arith.cmpi eq, %arg1, %c0_i32 : i32
    %13 = arith.extui %12 : i1 to i32
    %c0_i32_9 = arith.constant 0 : i32
    %14 = arith.cmpi ne, %13, %c0_i32_9 : i32
    scf.if %14 {
      %c0_120 = arith.constant 0 : index
      %c16_121 = arith.constant 16 : index
      %159 = vector.load %arg8[%c0_120, %c16_121] : memref<4x177xf32, #tpu.memory_space<vmem>>, vector<4x16xf32>
      tpu.vector_store %arg8[%c0_120, %c16_121], %11 {strides = array<i32>} : memref<4x177xf32, #tpu.memory_space<vmem>>, vector<4x16xf32>,
    } else {
    }
    %c1_i32 = arith.constant 1 : i32
    %15 = arith.cmpi eq, %arg1, %c1_i32 : i32
    %16 = arith.extui %15 : i1 to i32
    %c0_i32_10 = arith.constant 0 : i32
    %17 = arith.cmpi ne, %16, %c0_i32_10 : i32
    scf.if %17 {
      %c0_120 = arith.constant 0 : index
      %c160 = arith.constant 160 : index
      %159 = vector.load %arg8[%c0_120, %c160] : memref<4x177xf32, #tpu.memory_space<vmem>>, vector<4x16xf32>
      tpu.vector_store %arg8[%c0_120, %c160], %11 {strides = array<i32>} : memref<4x177xf32, #tpu.memory_space<vmem>>, vector<4x16xf32>,
    } else {
    }
    %18 = tpu.iota {dimensions = array<i32: 1>} : vector<1x128xi32>
    %c16_i32 = arith.constant 16 : i32
    %c0_i32_11 = arith.constant 0 : i32
    %19 = arith.cmpi eq, %c16_i32, %c0_i32_11 : i32
    %c1_i32_12 = arith.constant 1 : i32
    %20 = arith.select %19, %c1_i32_12, %c16_i32 : i32
    %21 = vector.broadcast %20 : i32 to vector<1x128xi32>
    %22 = arith.remsi %18, %21 : vector<1x128xi32>
    %c0_i32_13 = arith.constant 0 : i32
    %23 = vector.broadcast %c0_i32_13 : i32 to vector<1x128xi32>
    %24 = arith.cmpi ne, %22, %23 : vector<1x128xi32>
    %c0_i32_14 = arith.constant 0 : i32
    %25 = vector.broadcast %c0_i32_14 : i32 to vector<1x128xi32>
    %26 = arith.cmpi slt, %22, %25 : vector<1x128xi32>
    %c0_i32_15 = arith.constant 0 : i32
    %27 = arith.cmpi slt, %20, %c0_i32_15 : i32
    %28 = vector.broadcast %27 : i1 to vector<1x128xi1>
    %29 = vector.broadcast %28 : vector<1x128xi1> to vector<1x128xi1>
    %30 = arith.xori %26, %29 : vector<1x128xi1>
    %31 = arith.andi %30, %24 : vector<1x128xi1>
    %32 = vector.broadcast %20 : i32 to vector<1x128xi32>
    %33 = arith.addi %22, %32 : vector<1x128xi32>
    %34 = arith.select %31, %33, %22 : vector<1x128xi1>, vector<1x128xi32>
    %c1_i32_16 = arith.constant 1 : i32
    %35 = vector.broadcast %c1_i32_16 : i32 to vector<1x128xi32>
    %36 = arith.cmpi sge, %34, %35 : vector<1x128xi32>
    %c15_i32 = arith.constant 15 : i32
    %37 = vector.broadcast %c15_i32 : i32 to vector<1x128xi32>
    %38 = arith.cmpi slt, %34, %37 : vector<1x128xi32>
    %c0_17 = arith.constant 0 : index
    %c0_18 = arith.constant 0 : index
    %39 = vector.load %arg6[%c0_17, %c0_18] : memref<8x1xf32, #tpu.memory_space<vmem>>, vector<8x1xf32>
    %40 = vector.shape_cast %39 : vector<8x1xf32> to vector<8x1xf32>
    %41 = vector.broadcast %40 : vector<8x1xf32> to vector<8x128xf32>
    %c0_19 = arith.constant 0 : index
    %c0_20 = arith.constant 0 : index
    %c0_21 = arith.constant 0 : index
    %42 = vector.load %arg7[%c0_19, %c0_20, %c0_21] : memref<1x8x128xf32, #tpu.memory_space<vmem>>, vector<1x8x128xf32>
    %43 = vector.shape_cast %42 : vector<1x8x128xf32> to vector<8x128xf32>
    %44 = vector.shape_cast %41 : vector<8x128xf32> to vector<1x8x128xf32>
    tpu.vector_store %arg7[%c0_19, %c0_20, %c0_21], %44 {strides = array<i32>} : memref<1x8x128xf32, #tpu.memory_space<vmem>>, vector<1x8x128xf32>,
    %c0_22 = arith.constant 0 : index
    %c15 = arith.constant 15 : index
    %45 = vector.load %arg8[%c0_22, %c15] : memref<4x177xf32, #tpu.memory_space<vmem>>, vector<4x128xf32>
    %cst_23 = arith.constant 0.000000e+00 : f32
    %46 = vector.shape_cast %36 : vector<1x128xi1> to vector<1x128xi1>
    %47 = vector.broadcast %46 : vector<1x128xi1> to vector<4x128xi1>
    %48 = vector.broadcast %cst_23 : f32 to vector<4x128xf32>
    %49 = arith.select %47, %45, %48 : vector<4x128xi1>, vector<4x128xf32>
    %c0_24 = arith.constant 0 : index
    %c0_25 = arith.constant 0 : index
    %c0_26 = arith.constant 0 : index
    %50 = vector.load %arg7[%c0_24, %c0_25, %c0_26] : memref<1x8x128xf32, #tpu.memory_space<vmem>>, vector<1x8x128xf32>
    %51 = vector.shape_cast %50 : vector<1x8x128xf32> to vector<8x128xf32>
    %c0_27 = arith.constant 0 : index
    %c0_28 = arith.constant 0 : index
    %c0_29 = arith.constant 0 : index
    %52 = vector.load %arg5[%c0_27, %c0_28, %c0_29] : memref<9x8x4xf32, #tpu.memory_space<vmem>>, vector<1x8x4xf32>
    %53 = vector.shape_cast %52 : vector<1x8x4xf32> to vector<8x4xf32>
    %cst_30 = arith.constant dense<0.000000e+00> : vector<8x128xf32>
    %54 = tpu.matmul %53, %49, %cst_30 {dimension_numbers = #tpu.dot_dimension_numbers<[1], [0], [0], [1], [0, 0, 1, 1], [], []>} : vector<8x4xf32>, vector<4x128xf32>, vector<8x128xf32> -> vector<8x128xf32>
    %55 = arith.addf %51, %54 : vector<8x128xf32>
    %c0_31 = arith.constant 0 : index
    %c0_32 = arith.constant 0 : index
    %c0_33 = arith.constant 0 : index
    %56 = vector.load %arg7[%c0_31, %c0_32, %c0_33] : memref<1x8x128xf32, #tpu.memory_space<vmem>>, vector<1x8x128xf32>
    %57 = vector.shape_cast %56 : vector<1x8x128xf32> to vector<8x128xf32>
    %58 = vector.shape_cast %55 : vector<8x128xf32> to vector<1x8x128xf32>
    tpu.vector_store %arg7[%c0_31, %c0_32, %c0_33], %58 {strides = array<i32>} : memref<1x8x128xf32, #tpu.memory_space<vmem>>, vector<1x8x128xf32>,
    %c0_34 = arith.constant 0 : index
    %c16_35 = arith.constant 16 : index
    %59 = vector.load %arg8[%c0_34, %c16_35] : memref<4x177xf32, #tpu.memory_space<vmem>>, vector<4x128xf32>
    %c0_36 = arith.constant 0 : index
    %c0_37 = arith.constant 0 : index
    %c0_38 = arith.constant 0 : index
    %60 = vector.load %arg7[%c0_36, %c0_37, %c0_38] : memref<1x8x128xf32, #tpu.memory_space<vmem>>, vector<1x8x128xf32>
    %61 = vector.shape_cast %60 : vector<1x8x128xf32> to vector<8x128xf32>
    %c1 = arith.constant 1 : index
    %c0_39 = arith.constant 0 : index
    %c0_40 = arith.constant 0 : index
    %62 = vector.load %arg5[%c1, %c0_39, %c0_40] : memref<9x8x4xf32, #tpu.memory_space<vmem>>, vector<1x8x4xf32>
    %63 = vector.shape_cast %62 : vector<1x8x4xf32> to vector<8x4xf32>
    %cst_41 = arith.constant dense<0.000000e+00> : vector<8x128xf32>
    %64 = tpu.matmul %63, %59, %cst_41 {dimension_numbers = #tpu.dot_dimension_numbers<[1], [0], [0], [1], [0, 0, 1, 1], [], []>} : vector<8x4xf32>, vector<4x128xf32>, vector<8x128xf32> -> vector<8x128xf32>
    %65 = arith.addf %61, %64 : vector<8x128xf32>
    %c0_42 = arith.constant 0 : index
    %c0_43 = arith.constant 0 : index
    %c0_44 = arith.constant 0 : index
    %66 = vector.load %arg7[%c0_42, %c0_43, %c0_44] : memref<1x8x128xf32, #tpu.memory_space<vmem>>, vector<1x8x128xf32>
    %67 = vector.shape_cast %66 : vector<1x8x128xf32> to vector<8x128xf32>
    %68 = vector.shape_cast %65 : vector<8x128xf32> to vector<1x8x128xf32>
    tpu.vector_store %arg7[%c0_42, %c0_43, %c0_44], %68 {strides = array<i32>} : memref<1x8x128xf32, #tpu.memory_space<vmem>>, vector<1x8x128xf32>,
    %c0_45 = arith.constant 0 : index
    %c17 = arith.constant 17 : index
    %69 = vector.load %arg8[%c0_45, %c17] : memref<4x177xf32, #tpu.memory_space<vmem>>, vector<4x128xf32>
    %cst_46 = arith.constant 0.000000e+00 : f32
    %70 = vector.shape_cast %38 : vector<1x128xi1> to vector<1x128xi1>
    %71 = vector.broadcast %70 : vector<1x128xi1> to vector<4x128xi1>
    %72 = vector.broadcast %cst_46 : f32 to vector<4x128xf32>
    %73 = arith.select %71, %69, %72 : vector<4x128xi1>, vector<4x128xf32>
    %c0_47 = arith.constant 0 : index
    %c0_48 = arith.constant 0 : index
    %c0_49 = arith.constant 0 : index
    %74 = vector.load %arg7[%c0_47, %c0_48, %c0_49] : memref<1x8x128xf32, #tpu.memory_space<vmem>>, vector<1x8x128xf32>
    %75 = vector.shape_cast %74 : vector<1x8x128xf32> to vector<8x128xf32>
    %c2 = arith.constant 2 : index
    %c0_50 = arith.constant 0 : index
    %c0_51 = arith.constant 0 : index
    %76 = vector.load %arg5[%c2, %c0_50, %c0_51] : memref<9x8x4xf32, #tpu.memory_space<vmem>>, vector<1x8x4xf32>
    %77 = vector.shape_cast %76 : vector<1x8x4xf32> to vector<8x4xf32>
    %cst_52 = arith.constant dense<0.000000e+00> : vector<8x128xf32>
    %78 = tpu.matmul %77, %73, %cst_52 {dimension_numbers = #tpu.dot_dimension_numbers<[1], [0], [0], [1], [0, 0, 1, 1], [], []>} : vector<8x4xf32>, vector<4x128xf32>, vector<8x128xf32> -> vector<8x128xf32>
    %79 = arith.addf %75, %78 : vector<8x128xf32>
    %c0_53 = arith.constant 0 : index
    %c0_54 = arith.constant 0 : index
    %c0_55 = arith.constant 0 : index
    %80 = vector.load %arg7[%c0_53, %c0_54, %c0_55] : memref<1x8x128xf32, #tpu.memory_space<vmem>>, vector<1x8x128xf32>
    %81 = vector.shape_cast %80 : vector<1x8x128xf32> to vector<8x128xf32>
    %82 = vector.shape_cast %79 : vector<8x128xf32> to vector<1x8x128xf32>
    tpu.vector_store %arg7[%c0_53, %c0_54, %c0_55], %82 {strides = array<i32>} : memref<1x8x128xf32, #tpu.memory_space<vmem>>, vector<1x8x128xf32>,
    %c0_56 = arith.constant 0 : index
    %c31 = arith.constant 31 : index
    %83 = vector.load %arg8[%c0_56, %c31] : memref<4x177xf32, #tpu.memory_space<vmem>>, vector<4x128xf32>
    %cst_57 = arith.constant 0.000000e+00 : f32
    %84 = vector.shape_cast %36 : vector<1x128xi1> to vector<1x128xi1>
    %85 = vector.broadcast %84 : vector<1x128xi1> to vector<4x128xi1>
    %86 = vector.broadcast %cst_57 : f32 to vector<4x128xf32>
    %87 = arith.select %85, %83, %86 : vector<4x128xi1>, vector<4x128xf32>
    %c0_58 = arith.constant 0 : index
    %c0_59 = arith.constant 0 : index
    %c0_60 = arith.constant 0 : index
    %88 = vector.load %arg7[%c0_58, %c0_59, %c0_60] : memref<1x8x128xf32, #tpu.memory_space<vmem>>, vector<1x8x128xf32>
    %89 = vector.shape_cast %88 : vector<1x8x128xf32> to vector<8x128xf32>
    %c3 = arith.constant 3 : index
    %c0_61 = arith.constant 0 : index
    %c0_62 = arith.constant 0 : index
    %90 = vector.load %arg5[%c3, %c0_61, %c0_62] : memref<9x8x4xf32, #tpu.memory_space<vmem>>, vector<1x8x4xf32>
    %91 = vector.shape_cast %90 : vector<1x8x4xf32> to vector<8x4xf32>
    %cst_63 = arith.constant dense<0.000000e+00> : vector<8x128xf32>
    %92 = tpu.matmul %91, %87, %cst_63 {dimension_numbers = #tpu.dot_dimension_numbers<[1], [0], [0], [1], [0, 0, 1, 1], [], []>} : vector<8x4xf32>, vector<4x128xf32>, vector<8x128xf32> -> vector<8x128xf32>
    %93 = arith.addf %89, %92 : vector<8x128xf32>
    %c0_64 = arith.constant 0 : index
    %c0_65 = arith.constant 0 : index
    %c0_66 = arith.constant 0 : index
    %94 = vector.load %arg7[%c0_64, %c0_65, %c0_66] : memref<1x8x128xf32, #tpu.memory_space<vmem>>, vector<1x8x128xf32>
    %95 = vector.shape_cast %94 : vector<1x8x128xf32> to vector<8x128xf32>
    %96 = vector.shape_cast %93 : vector<8x128xf32> to vector<1x8x128xf32>
    tpu.vector_store %arg7[%c0_64, %c0_65, %c0_66], %96 {strides = array<i32>} : memref<1x8x128xf32, #tpu.memory_space<vmem>>, vector<1x8x128xf32>,
    %c0_67 = arith.constant 0 : index
    %c32 = arith.constant 32 : index
    %97 = vector.load %arg8[%c0_67, %c32] : memref<4x177xf32, #tpu.memory_space<vmem>>, vector<4x128xf32>
    %c0_68 = arith.constant 0 : index
    %c0_69 = arith.constant 0 : index
    %c0_70 = arith.constant 0 : index
    %98 = vector.load %arg7[%c0_68, %c0_69, %c0_70] : memref<1x8x128xf32, #tpu.memory_space<vmem>>, vector<1x8x128xf32>
    %99 = vector.shape_cast %98 : vector<1x8x128xf32> to vector<8x128xf32>
    %c4 = arith.constant 4 : index
    %c0_71 = arith.constant 0 : index
    %c0_72 = arith.constant 0 : index
    %100 = vector.load %arg5[%c4, %c0_71, %c0_72] : memref<9x8x4xf32, #tpu.memory_space<vmem>>, vector<1x8x4xf32>
    %101 = vector.shape_cast %100 : vector<1x8x4xf32> to vector<8x4xf32>
    %cst_73 = arith.constant dense<0.000000e+00> : vector<8x128xf32>
    %102 = tpu.matmul %101, %97, %cst_73 {dimension_numbers = #tpu.dot_dimension_numbers<[1], [0], [0], [1], [0, 0, 1, 1], [], []>} : vector<8x4xf32>, vector<4x128xf32>, vector<8x128xf32> -> vector<8x128xf32>
    %103 = arith.addf %99, %102 : vector<8x128xf32>
    %c0_74 = arith.constant 0 : index
    %c0_75 = arith.constant 0 : index
    %c0_76 = arith.constant 0 : index
    %104 = vector.load %arg7[%c0_74, %c0_75, %c0_76] : memref<1x8x128xf32, #tpu.memory_space<vmem>>, vector<1x8x128xf32>
    %105 = vector.shape_cast %104 : vector<1x8x128xf32> to vector<8x128xf32>
    %106 = vector.shape_cast %103 : vector<8x128xf32> to vector<1x8x128xf32>
    tpu.vector_store %arg7[%c0_74, %c0_75, %c0_76], %106 {strides = array<i32>} : memref<1x8x128xf32, #tpu.memory_space<vmem>>, vector<1x8x128xf32>,
    %c0_77 = arith.constant 0 : index
    %c33 = arith.constant 33 : index
    %107 = vector.load %arg8[%c0_77, %c33] : memref<4x177xf32, #tpu.memory_space<vmem>>, vector<4x128xf32>
    %cst_78 = arith.constant 0.000000e+00 : f32
    %108 = vector.shape_cast %38 : vector<1x128xi1> to vector<1x128xi1>
    %109 = vector.broadcast %108 : vector<1x128xi1> to vector<4x128xi1>
    %110 = vector.broadcast %cst_78 : f32 to vector<4x128xf32>
    %111 = arith.select %109, %107, %110 : vector<4x128xi1>, vector<4x128xf32>
    %c0_79 = arith.constant 0 : index
    %c0_80 = arith.constant 0 : index
    %c0_81 = arith.constant 0 : index
    %112 = vector.load %arg7[%c0_79, %c0_80, %c0_81] : memref<1x8x128xf32, #tpu.memory_space<vmem>>, vector<1x8x128xf32>
    %113 = vector.shape_cast %112 : vector<1x8x128xf32> to vector<8x128xf32>
    %c5 = arith.constant 5 : index
    %c0_82 = arith.constant 0 : index
    %c0_83 = arith.constant 0 : index
    %114 = vector.load %arg5[%c5, %c0_82, %c0_83] : memref<9x8x4xf32, #tpu.memory_space<vmem>>, vector<1x8x4xf32>
    %115 = vector.shape_cast %114 : vector<1x8x4xf32> to vector<8x4xf32>
    %cst_84 = arith.constant dense<0.000000e+00> : vector<8x128xf32>
    %116 = tpu.matmul %115, %111, %cst_84 {dimension_numbers = #tpu.dot_dimension_numbers<[1], [0], [0], [1], [0, 0, 1, 1], [], []>} : vector<8x4xf32>, vector<4x128xf32>, vector<8x128xf32> -> vector<8x128xf32>
    %117 = arith.addf %113, %116 : vector<8x128xf32>
    %c0_85 = arith.constant 0 : index
    %c0_86 = arith.constant 0 : index
    %c0_87 = arith.constant 0 : index
    %118 = vector.load %arg7[%c0_85, %c0_86, %c0_87] : memref<1x8x128xf32, #tpu.memory_space<vmem>>, vector<1x8x128xf32>
    %119 = vector.shape_cast %118 : vector<1x8x128xf32> to vector<8x128xf32>
    %120 = vector.shape_cast %117 : vector<8x128xf32> to vector<1x8x128xf32>
    tpu.vector_store %arg7[%c0_85, %c0_86, %c0_87], %120 {strides = array<i32>} : memref<1x8x128xf32, #tpu.memory_space<vmem>>, vector<1x8x128xf32>,
    %c0_88 = arith.constant 0 : index
    %c47 = arith.constant 47 : index
    %121 = vector.load %arg8[%c0_88, %c47] : memref<4x177xf32, #tpu.memory_space<vmem>>, vector<4x128xf32>
    %cst_89 = arith.constant 0.000000e+00 : f32
    %122 = vector.shape_cast %36 : vector<1x128xi1> to vector<1x128xi1>
    %123 = vector.broadcast %122 : vector<1x128xi1> to vector<4x128xi1>
    %124 = vector.broadcast %cst_89 : f32 to vector<4x128xf32>
    %125 = arith.select %123, %121, %124 : vector<4x128xi1>, vector<4x128xf32>
    %c0_90 = arith.constant 0 : index
    %c0_91 = arith.constant 0 : index
    %c0_92 = arith.constant 0 : index
    %126 = vector.load %arg7[%c0_90, %c0_91, %c0_92] : memref<1x8x128xf32, #tpu.memory_space<vmem>>, vector<1x8x128xf32>
    %127 = vector.shape_cast %126 : vector<1x8x128xf32> to vector<8x128xf32>
    %c6 = arith.constant 6 : index
    %c0_93 = arith.constant 0 : index
    %c0_94 = arith.constant 0 : index
    %128 = vector.load %arg5[%c6, %c0_93, %c0_94] : memref<9x8x4xf32, #tpu.memory_space<vmem>>, vector<1x8x4xf32>
    %129 = vector.shape_cast %128 : vector<1x8x4xf32> to vector<8x4xf32>
    %cst_95 = arith.constant dense<0.000000e+00> : vector<8x128xf32>
    %130 = tpu.matmul %129, %125, %cst_95 {dimension_numbers = #tpu.dot_dimension_numbers<[1], [0], [0], [1], [0, 0, 1, 1], [], []>} : vector<8x4xf32>, vector<4x128xf32>, vector<8x128xf32> -> vector<8x128xf32>
    %131 = arith.addf %127, %130 : vector<8x128xf32>
    %c0_96 = arith.constant 0 : index
    %c0_97 = arith.constant 0 : index
    %c0_98 = arith.constant 0 : index
    %132 = vector.load %arg7[%c0_96, %c0_97, %c0_98] : memref<1x8x128xf32, #tpu.memory_space<vmem>>, vector<1x8x128xf32>
    %133 = vector.shape_cast %132 : vector<1x8x128xf32> to vector<8x128xf32>
    %134 = vector.shape_cast %131 : vector<8x128xf32> to vector<1x8x128xf32>
    tpu.vector_store %arg7[%c0_96, %c0_97, %c0_98], %134 {strides = array<i32>} : memref<1x8x128xf32, #tpu.memory_space<vmem>>, vector<1x8x128xf32>,
    %c0_99 = arith.constant 0 : index
    %c48 = arith.constant 48 : index
    %135 = vector.load %arg8[%c0_99, %c48] : memref<4x177xf32, #tpu.memory_space<vmem>>, vector<4x128xf32>
    %c0_100 = arith.constant 0 : index
    %c0_101 = arith.constant 0 : index
    %c0_102 = arith.constant 0 : index
    %136 = vector.load %arg7[%c0_100, %c0_101, %c0_102] : memref<1x8x128xf32, #tpu.memory_space<vmem>>, vector<1x8x128xf32>
    %137 = vector.shape_cast %136 : vector<1x8x128xf32> to vector<8x128xf32>
    %c7 = arith.constant 7 : index
    %c0_103 = arith.constant 0 : index
    %c0_104 = arith.constant 0 : index
    %138 = vector.load %arg5[%c7, %c0_103, %c0_104] : memref<9x8x4xf32, #tpu.memory_space<vmem>>, vector<1x8x4xf32>
    %139 = vector.shape_cast %138 : vector<1x8x4xf32> to vector<8x4xf32>
    %cst_105 = arith.constant dense<0.000000e+00> : vector<8x128xf32>
    %140 = tpu.matmul %139, %135, %cst_105 {dimension_numbers = #tpu.dot_dimension_numbers<[1], [0], [0], [1], [0, 0, 1, 1], [], []>} : vector<8x4xf32>, vector<4x128xf32>, vector<8x128xf32> -> vector<8x128xf32>
    %141 = arith.addf %137, %140 : vector<8x128xf32>
    %c0_106 = arith.constant 0 : index
    %c0_107 = arith.constant 0 : index
    %c0_108 = arith.constant 0 : index
    %142 = vector.load %arg7[%c0_106, %c0_107, %c0_108] : memref<1x8x128xf32, #tpu.memory_space<vmem>>, vector<1x8x128xf32>
    %143 = vector.shape_cast %142 : vector<1x8x128xf32> to vector<8x128xf32>
    %144 = vector.shape_cast %141 : vector<8x128xf32> to vector<1x8x128xf32>
    tpu.vector_store %arg7[%c0_106, %c0_107, %c0_108], %144 {strides = array<i32>} : memref<1x8x128xf32, #tpu.memory_space<vmem>>, vector<1x8x128xf32>,
    %c0_109 = arith.constant 0 : index
    %c49 = arith.constant 49 : index
    %145 = vector.load %arg8[%c0_109, %c49] : memref<4x177xf32, #tpu.memory_space<vmem>>, vector<4x128xf32>
    %cst_110 = arith.constant 0.000000e+00 : f32
    %146 = vector.shape_cast %38 : vector<1x128xi1> to vector<1x128xi1>
    %147 = vector.broadcast %146 : vector<1x128xi1> to vector<4x128xi1>
    %148 = vector.broadcast %cst_110 : f32 to vector<4x128xf32>
    %149 = arith.select %147, %145, %148 : vector<4x128xi1>, vector<4x128xf32>
    %c0_111 = arith.constant 0 : index
    %c0_112 = arith.constant 0 : index
    %c0_113 = arith.constant 0 : index
    %150 = vector.load %arg7[%c0_111, %c0_112, %c0_113] : memref<1x8x128xf32, #tpu.memory_space<vmem>>, vector<1x8x128xf32>
    %151 = vector.shape_cast %150 : vector<1x8x128xf32> to vector<8x128xf32>
    %c8 = arith.constant 8 : index
    %c0_114 = arith.constant 0 : index
    %c0_115 = arith.constant 0 : index
    %152 = vector.load %arg5[%c8, %c0_114, %c0_115] : memref<9x8x4xf32, #tpu.memory_space<vmem>>, vector<1x8x4xf32>
    %153 = vector.shape_cast %152 : vector<1x8x4xf32> to vector<8x4xf32>
    %cst_116 = arith.constant dense<0.000000e+00> : vector<8x128xf32>
    %154 = tpu.matmul %153, %149, %cst_116 {dimension_numbers = #tpu.dot_dimension_numbers<[1], [0], [0], [1], [0, 0, 1, 1], [], []>} : vector<8x4xf32>, vector<4x128xf32>, vector<8x128xf32> -> vector<8x128xf32>
    %155 = arith.addf %151, %154 : vector<8x128xf32>
    %c0_117 = arith.constant 0 : index
    %c0_118 = arith.constant 0 : index
    %c0_119 = arith.constant 0 : index
    %156 = vector.load %arg7[%c0_117, %c0_118, %c0_119] : memref<1x8x128xf32, #tpu.memory_space<vmem>>, vector<1x8x128xf32>
    %157 = vector.shape_cast %156 : vector<1x8x128xf32> to vector<8x128xf32>
    %158 = vector.shape_cast %155 : vector<8x128xf32> to vector<1x8x128xf32>
    tpu.vector_store %arg7[%c0_117, %c0_118, %c0_119], %158 {strides = array<i32>} : memref<1x8x128xf32, #tpu.memory_space<vmem>>, vector<1x8x128xf32>,
    return
  }
  func.func @transform_0(%arg0: i32, %arg1: i32) -> (i32, i32, i32, i32) {
    %c0_i32 = arith.constant 0 : i32
    %c0_i32_0 = arith.constant 0 : i32
    %c0_i32_1 = arith.constant 0 : i32
    return %arg0, %arg1, %c0_i32, %c0_i32_0 : i32, i32, i32, i32
  }
  func.func @transform_1(%arg0: i32, %arg1: i32) -> (i32, i32) {
    %c0_i32 = arith.constant 0 : i32
    %c0_i32_0 = arith.constant 0 : i32
    %c0_i32_1 = arith.constant 0 : i32
    return %c0_i32, %c0_i32_0 : i32, i32
  }
  func.func @transform_2(%arg0: i32, %arg1: i32) -> (i32, i32) {
    %c0_i32 = arith.constant 0 : i32
    %c0_i32_0 = arith.constant 0 : i32
    %c0_i32_1 = arith.constant 0 : i32
    return %c0_i32, %c0_i32_0 : i32, i32
  }
  func.func @transform_3(%arg0: i32, %arg1: i32) -> (i32, i32, i32) {
    %c0_i32 = arith.constant 0 : i32
    %c0_i32_0 = arith.constant 0 : i32
    %c0_i32_1 = arith.constant 0 : i32
    %c0_i32_2 = arith.constant 0 : i32
    return %c0_i32, %c0_i32_0, %c0_i32_1 : i32, i32, i32
  }
  func.func @transform_4(%arg0: i32, %arg1: i32) -> (i32, i32) {
    %c0_i32 = arith.constant 0 : i32
    %c0_i32_0 = arith.constant 0 : i32
    %c0_i32_1 = arith.constant 0 : i32
    return %c0_i32, %c0_i32_0 : i32, i32
  }
  func.func @transform_5(%arg0: i32, %arg1: i32) -> (i32, i32, i32) {
    %c0_i32 = arith.constant 0 : i32
    %c0_i32_0 = arith.constant 0 : i32
    return %arg0, %c0_i32, %arg1 : i32, i32, i32
  }
}

</mosaic_0001>

<bundles_post_ra>
// kernel: bn_act_conv.1
= control target key start
LH: loop header
LB: loop body
LE: loop exit
PB: predicated region body
PF: predicated region fallthrough
CT: control target
= control target key end

     0   :  { %s1496_s18 = smov 0   ;;  %s1498_s19 = smov 0   ;;  %s1659_s0 = inlined_call_operand.vmem [shape: f32[2,2,4,160], index: 0, kind: input, shape index: {}]   ;;  %s1660_s1 = inlined_call_operand.vmem [shape: f32[4,1], index: 1, kind: input, shape index: {}]   ;;  %s1661_s2 = inlined_call_operand.vmem [shape: f32[4,1], index: 2, kind: input, shape index: {}]   ;;  %s1662_s3 = inlined_call_operand.vmem [shape: f32[9,8,4], index: 3, kind: input, shape index: {}]   ;;  %s1663_s4 = inlined_call_operand.vmem [shape: f32[8,1], index: 4, kind: input, shape index: {}]   ;;  %s1664_s5 = inlined_call_operand.vmem [shape: f32[2,8,256], index: 5, kind: output, shape index: {}]  }
   0x1   :  { %s1500_s20 = smov 0   ;;  %s1502_s21 = smov 0  }
   0x2   :  { %s1504_s22 = smov 0  }
   0x3 LB: > { %s24_s23 = sadd.s32 1, %s1440_s20  ;;  %s27_s24 = sadd.s32 1, %s1444_s21  ;;  %s1448_s22 = sphi %s1504_s22, %s15_s22   ;;  %s1444_s21 = sphi %s1502_s21, %s1672_s21   ;;  %s1440_s20 = sphi %s1500_s20, %s1671_s20   ;;  %s1436_s19 = sphi %s1498_s19, %s1670_s19   ;;  %s1432_s18 = sphi %s1496_s18, %s1669_s18  }
   0x4   : > { %p25_p0 = scmp.ge.s32.totalorder %s24_s23, 2  ;;  %p1252_p1 = scmp.ge.s32.totalorder %s1448_s22, 1 }
   0x5   : > { %p207_p2 = scmp.lt.s32.totalorder %s1448_s22, 5 }
   0x6   : > { %s1674_s23 = smov (%p25_p0, %s24_s23), 0  ;;  %s1676_s24 = smov (!%p25_p0, %s27_s24), %s1444_s21 }
   0x7   : > { %p208_p3 = pnand %p1252_p1, %p207_p2  ;;  %p29_p4 = scmp.ge.s32.totalorder %s1676_s24, 2 }
   0x8   : > { %p242_p5 = scmp.lt.s32.totalorder (!%p208_p3), %s1436_s19, 1  ;;  %p244_p6 = scmp.lt.s32.totalorder (!%p208_p3), %s1432_s18, 1 }
   0x9   : > { %s1678_s24 = smov (%p29_p4, %s1676_s24), 0  ;;  %211 = sbr.rel (%p208_p3) target bundleno = 633 (0x279), region = 40 }
   0xa   : > { %s1452_s25 = smov (!%p208_p3), 16   ;;  %p1258_p7 = scmp.ne.s32.totalorder (!%p208_p3), %s1432_s18, 0 }
   0xe   : > { %v260_v0 = vld [vmem:[%s1660_s1] sm:$0xf]  ;;  %v1450_v1 = vmov 0   ;;  %s1680_s19 = smov (!%p242_p5, %s1436_s19), 1  ;;  %v1451_v3 = vmov 839922192   ;;  %v268_v5 = vlaneseq }
   0xf   : > { %1407 = vset.pattern.permute.xlu0 %v1450_v1  ;;  %v274_v2 = vld [vmem:[%s1661_s2] sm:$0xf]  ;;  %s245_s29 = scalar_select %p244_p6, %s1432_s18, 1  ;;  %v266_v4 = vunpack.c.l.s4 %v1451_v3  ;;  %vm296_vm0 = vcmask 1043584   ;;  %vm297_vm1 = vcmask 392196   ;;  %vm293_vm2 = vcmask 130048  }
  0x10   : > { %263 = vperm.xlu0 %1407, %v260_v0   ;;  %s1256_s30 = sshll.u32 %s1680_s19, 1  ;;  %s1254_s12 = sshll.u32 %s1680_s19, 2  ;;  %v269_v7 = vshrl.u32 %v268_v5, 7  ;;  %vm298_vm3 = vmor %vm297_vm1, %vm296_vm0 }
  0x11   : > { %s256_s6 = sadd.s32 %s1256_s30, %s245_s29  ;;  %s1253_s11 = sshll.u32 %s245_s29, 1  ;;  %v267_v6 = vunpack.c.0.s8 %v266_v4 }
  0x12   : > { %s1257_s7 = sshll.u32 %s256_s6, 3  ;;  %s248_s13 = sadd.s32 %s1254_s12, %s1253_s11 }
  0x13   : > { %s1539_s10 = scalar_lea.vmem %s1664_s5, %s1257_s7  ;;  %s1255_s14 = sshll.u32 %s248_s13, 2  ;;  %v270_v8 = vsub.s32 %v267_v6, %v269_v7 }
  0x14   : > { %277 = vperm.xlu0 %1407, %v274_v2   ;;  %s250_s17 = scalar_lea.vmem %s1659_s0, %s1255_s14 }
  0x15   : > { %v259_v11 = vld [vmem:[%s250_s17] sm:$0xff] }
  0x8b   : > { %v264_v9 = vpop.permute.xlu0 %263 }
  0x8c   : > { %v271_v10 = vrot.slane %v264_v9, %v270_v8 }
  0x8e   : > { %v273_v13 = vmul.f32 %v271_v10, %v259_v11 }
  0x8f   : > { %v278_v12 = vpop.permute.xlu0 %277 }
  0x90   : > { %v285_v14 = vrot.slane %v278_v12, %v270_v8 }
  0x92   : > { %v287_v15 = vadd.f32 %v285_v14, %v273_v13 }
  0x94   : > { %v288_v16 = vmax.f32 %v287_v15, 0.0 }
  0x96   : > { %290 = vrot.lane.b32.xlu1 %v288_v16, %s1452_s25 }
 0x108   : > { %v291_v17 = vpop.permute.xlu1 %290  ;;  %303 = sbr.rel (%p1258_p7) target bundleno = 271 (0x10f), region = 44 }
 0x109   : > { %v292_v18 = vrot.slane %v291_v17, 4 }
 0x10b   : > { %v294_v19 = vsel %vm293_vm2, %v292_v18, %v291_v17 }
 0x10c   : > { %299 = vst.msk [vmem:[#allocation2] sm:$0xff] %vm298_vm3, %v294_v19 }
 0x10d   : > { %vm304_vm4 = vcmask 257152   ;;  %v1453_v20 = vmov 0.0  }
 0x10e   : > { %305 = vst.msk [vmem:[#allocation2] sm:$0xf] %vm304_vm4, %v1453_v20 }
 0x10f PF: > { %p1259_p8 = scmp.ne.s32.totalorder %s1432_s18, 1 }
 0x111   : > { %309 = sbr.rel (%p1259_p8) target bundleno = 280 (0x118), region = 48 }
 0x116   : > { %vm310_vm5 = vcmask 388352   ;;  %v1454_v21 = vmov 0.0  }
 0x117   : > { %311 = vst.msk [vmem:[#allocation2 + $0x4] sm:$0xf] %vm310_vm5, %v1454_v21 }
 0x118 PF: > { %1408 = vset.pattern.permute.xlu0 %v1450_v1  ;;  %s1455_s19 = smov 113   ;;  %s1456_s26 = smov 112   ;;  %v1457_v24 = vmov 0.0   ;;  %vm1458_vm6 = vmmov 0   ;;  %v328_v25 = vld [vmem:[%s1663_s4] sm:$0xff]  ;;  %v313_v26 = vand.u32 127, %v268_v5 }
 0x119   : > { %1306 = vmatprep.subr.mxu0 %v1457_v24  ;;  %1308 = vmatprep.mubr.msk.f32.mxu0 %vm1458_vm6, %v1457_v24  ;;  %s1459_s18 = smov 111   ;;  %s1460_s27 = smov 97   ;;  %vm344_vm7 = vcmask 924672   ;;  %vm440_vm8 = vcmask 916480   ;;  %vm354_vm10 = vcmask 1043456   ;;  %v1262_v33 = vld [vmem:[%s1662_s3 + $0x8] sm:$0xff] }
 0x11a   : > { %1311 = vmatprep.subr.mxu1 %v1457_v24  ;;  %1313 = vmatprep.mubr.msk.f32.mxu1 %vm1458_vm6, %v1457_v24  ;;  %s1461_s28 = smov 96   ;;  %s1462_s29 = smov 95   ;;  %v318_v27 = vand.u32 15, %v313_v26  ;;  %v349_v35 = vld [vmem:[%s1662_s3] sm:$0xff]  ;;  %vm350_vm11 = vcmask 31744   ;;  %vm528_vm12 = vcmask 908288  }
 0x11b   : > { %s1463_s30 = smov 81   ;;  %s1464_s6 = smov 80   ;;  %v1265_v42 = vld [vmem:[%s1662_s3 + $0x10] sm:$0xff]  ;;  %vm620_vm14 = vcmask 793600   ;;  %v1268_v47 = vld [vmem:[%s1662_s3 + $0x18] sm:$0xff]  ;;  %vm715_vm15 = vcmask 785408  }
 0x11c   : > { %s1465_s7 = smov 79   ;;  %vm1557_vm9 = vcmp.ge.s32.totalorder %v318_v27, 1  ;;  %vm1572_vm13 = vcmp.lt.s32.totalorder %v318_v27, 15  ;;  %v1271_v51 = vld [vmem:[%s1662_s3 + $0x20] sm:$0xff]  ;;  %vm801_vm0 = vcmask 777216   ;;  %v1274_v56 = vld [vmem:[%s1662_s3 + $0x28] sm:$0xff] }
 0x11d   : > { %vm893_vm1 = vcmask 662528   ;;  %v1277_v61 = vld [vmem:[%s1662_s3 + $0x30] sm:$0xff]  ;;  %vm988_vm2 = vcmask 654336   ;;  %v1280_v1 = vld [vmem:[%s1662_s3 + $0x38] sm:$0xff]  ;;  %vm1074_vm3 = vcmask 646144   ;;  %v1283_v6 = vld [vmem:[%s1662_s3 + $0x40] sm:$0xff] }
 0x11e   : > { %v335_v22 = vld [vmem:[#allocation2] sm:$0xff] }
 0x11f   : > { %340 = vrot.lane.b32.xlu0 %v335_v22, %s1455_s19  ;;  %v339_v23 = vcombine.high %v335_v22, %v335_v22  ;;  %436 = vrot.lane.b32.xlu1 %v335_v22, %s1456_s26 }
 0x123   : > { %342 = vrot.lane.b32.xlu0 %v339_v23, %s1455_s19  ;;  %438 = vrot.lane.b32.xlu1 %v339_v23, %s1456_s26 }
 0x127   : > { %526 = vrot.lane.b32.xlu1 %v339_v23, %s1459_s18  ;;  %524 = vrot.lane.b32.xlu0 %v335_v22, %s1459_s18 }
 0x12b   : > { %618 = vrot.lane.b32.xlu1 %v339_v23, %s1460_s27  ;;  %616 = vrot.lane.b32.xlu0 %v335_v22, %s1460_s27 }
 0x12f   : > { %713 = vrot.lane.b32.xlu1 %v339_v23, %s1461_s28  ;;  %711 = vrot.lane.b32.xlu0 %v335_v22, %s1461_s28 }
 0x133   : > { %799 = vrot.lane.b32.xlu1 %v339_v23, %s1462_s29  ;;  %797 = vrot.lane.b32.xlu0 %v335_v22, %s1462_s29 }
 0x137   : > { %891 = vrot.lane.b32.xlu1 %v339_v23, %s1463_s30  ;;  %889 = vrot.lane.b32.xlu0 %v335_v22, %s1463_s30 }
 0x13b   : > { %986 = vrot.lane.b32.xlu1 %v339_v23, %s1464_s6  ;;  %984 = vrot.lane.b32.xlu0 %v335_v22, %s1464_s6 }
 0x13f   : > { %1072 = vrot.lane.b32.xlu1 %v339_v23, %s1465_s7  ;;  %1070 = vrot.lane.b32.xlu0 %v335_v22, %s1465_s7 }
 0x143   : > { %331 = vperm.xlu0 %1408, %v328_v25  }
 0x191   : > { %v341_v28 = vpop.permute.xlu0 %340  ;;  %v437_v29 = vpop.permute.xlu1 %436 }
 0x195   : > { %v343_v31 = vpop.permute.xlu0 %342  ;;  %v439_v32 = vpop.permute.xlu1 %438 }
 0x196   : > { %v345_v34 = vsel %vm344_vm7, %v341_v28, %v343_v31  ;;  %v441_v36 = vsel %vm440_vm8, %v437_v29, %v439_v32 }
 0x197   : > { %v347_v37 = vsel %vm1557_vm9, %v345_v34, 0.0  ;;  %1312 = vmatpush3.msk.msra.mxu1 %vm354_vm10, %v441_v36 }
 0x198   : > { %1307 = vmatpush3.msk.msra.mxu0 %vm354_vm10, %v347_v37  ;;  %1314 = vmatmul.mubr.msk.f32.vlgmr.msra.gmra.mxu1 %vm350_vm11, %v1262_v33 }
 0x199   : > { %1309 = vmatmul.mubr.msk.f32.vlgmr.msra.gmra.mxu0 %vm350_vm11, %v349_v35  ;;  %v527_v39 = vpop.permute.xlu1 %526  ;;  %v525_v40 = vpop.permute.xlu0 %524  ;;  %1316 = vmatprep.subr.mxu0 %v1457_v24 }
 0x19a   : > { %v529_v41 = vsel %vm528_vm12, %v525_v40, %v527_v39  ;;  %1318 = vmatprep.mubr.msk.f32.mxu0 %vm1458_vm6, %v1457_v24  ;;  %1321 = vmatprep.subr.mxu1 %v1457_v24 }
 0x19b   : > { %v531_v43 = vsel %vm1572_vm13, %v529_v41, 0.0  ;;  %1323 = vmatprep.mubr.msk.f32.mxu1 %vm1458_vm6, %v1457_v24 }
 0x19c   : > { %1317 = vmatpush3.msk.msra.mxu0 %vm354_vm10, %v531_v43 }
 0x19d   : > { %1319 = vmatmul.mubr.msk.f32.vlgmr.msra.gmra.mxu0 %vm350_vm11, %v1265_v42  ;;  %v619_v44 = vpop.permute.xlu1 %618  ;;  %v617_v45 = vpop.permute.xlu0 %616  ;;  %1326 = vmatprep.subr.mxu0 %v1457_v24 }
 0x19e   : > { %v621_v46 = vsel %vm620_vm14, %v617_v45, %v619_v44  ;;  %1328 = vmatprep.mubr.msk.f32.mxu0 %vm1458_vm6, %v1457_v24 }
 0x19f   : > { %v623_v48 = vsel %vm1557_vm9, %v621_v46, 0.0 }
 0x1a0   : > { %1322 = vmatpush3.msk.msra.mxu1 %vm354_vm10, %v623_v48 }
 0x1a1   : > { %1324 = vmatmul.mubr.msk.f32.vlgmr.msra.gmra.mxu1 %vm350_vm11, %v1268_v47  ;;  %v714_v49 = vpop.permute.xlu1 %713  ;;  %v712_v50 = vpop.permute.xlu0 %711  ;;  %1331 = vmatprep.subr.mxu1 %v1457_v24 }
 0x1a2   : > { %v716_v52 = vsel %vm715_vm15, %v712_v50, %v714_v49  ;;  %1333 = vmatprep.mubr.msk.f32.mxu1 %vm1458_vm6, %v1457_v24 }
 0x1a3   : > { %1327 = vmatpush3.msk.msra.mxu0 %vm354_vm10, %v716_v52 }
 0x1a4   : > { %1329 = vmatmul.mubr.msk.f32.vlgmr.msra.gmra.mxu0 %vm350_vm11, %v1271_v51  ;;  %1336 = vmatprep.subr.mxu0 %v1457_v24 }
 0x1a5   : > { %v800_v53 = vpop.permute.xlu1 %799  ;;  %v798_v54 = vpop.permute.xlu0 %797  ;;  %1338 = vmatprep.mubr.msk.f32.mxu0 %vm1458_vm6, %v1457_v24 }
 0x1a6   : > { %v802_v55 = vsel %vm801_vm0, %v798_v54, %v800_v53 }
 0x1a7   : > { %v804_v57 = vsel %vm1572_vm13, %v802_v55, 0.0 }
 0x1a8   : > { %1332 = vmatpush3.msk.msra.mxu1 %vm354_vm10, %v804_v57 }
 0x1a9   : > { %1334 = vmatmul.mubr.msk.f32.vlgmr.msra.gmra.mxu1 %vm350_vm11, %v1274_v56  ;;  %v892_v58 = vpop.permute.xlu1 %891  ;;  %v890_v59 = vpop.permute.xlu0 %889  ;;  %1341 = vmatprep.subr.mxu1 %v1457_v24 }
 0x1aa   : > { %v894_v60 = vsel %vm893_vm1, %v890_v59, %v892_v58  ;;  %1343 = vmatprep.mubr.msk.f32.mxu1 %vm1458_vm6, %v1457_v24 }
 0x1ab   : > { %v896_v62 = vsel %vm1557_vm9, %v894_v60, 0.0 }
 0x1ac   : > { %1337 = vmatpush3.msk.msra.mxu0 %vm354_vm10, %v896_v62 }
 0x1ad   : > { %1339 = vmatmul.mubr.msk.f32.vlgmr.msra.gmra.mxu0 %vm350_vm11, %v1277_v61  ;;  %v987_v63 = vpop.permute.xlu1 %986  ;;  %v985_v0 = vpop.permute.xlu0 %984  ;;  %1346 = vmatprep.subr.mxu0 %v1457_v24 }
 0x1ae   : > { %v989_v2 = vsel %vm988_vm2, %v985_v0, %v987_v63  ;;  %1348 = vmatprep.mubr.msk.f32.mxu0 %vm1458_vm6, %v1457_v24 }
 0x1af   : > { %1342 = vmatpush3.msk.msra.mxu1 %vm354_vm10, %v989_v2 }
 0x1b0   : > { %1344 = vmatmul.mubr.msk.f32.vlgmr.msra.gmra.mxu1 %vm350_vm11, %v1280_v1 }
 0x1b1   : > { %v1073_v3 = vpop.permute.xlu1 %1072  ;;  %v1071_v4 = vpop.permute.xlu0 %1070 }
 0x1b2   : > { %v1075_v5 = vsel %vm1074_vm3, %v1071_v4, %v1073_v3 }
 0x1b3   : > { %v1077_v7 = vsel %vm1572_vm13, %v1075_v5, 0.0 }
 0x1b4   : > { %1347 = vmatpush3.msk.msra.mxu0 %vm354_vm10, %v1077_v7 }
 0x1b5   : > { %1349 = vmatmul.mubr.msk.f32.vlgmr.msra.gmra.mxu0 %vm350_vm11, %v1283_v6 }
 0x1be   : > { %v332_v8 = vpop.permute.xlu0 %331 }
 0x258   : > { %v513_v9 = vpop.f32.mrf.mxu1 }
 0x259   : > { %v424_v10 = vpop.f32.mrf.mxu0 }
 0x25a   : > { %v428_v11 = vadd.f32 %v424_v10, %v332_v8  ;;  %v1315_v12 = vpop.f32.mrf.mxu1 }
 0x25b   : > { %v1310_v13 = vpop.f32.mrf.mxu0 }
 0x25c   : > { %v517_v14 = vadd.f32 %v513_v9, %v428_v11 }
 0x25d   : > { %v607_v15 = vpop.f32.mrf.mxu0 }
 0x25e   : > { %v611_v16 = vadd.f32 %v607_v15, %v517_v14 }
 0x25f   : > { %v1320_v17 = vpop.f32.mrf.mxu0 }
 0x261   : > { %v699_v18 = vpop.f32.mrf.mxu1 }
 0x262   : > { %v703_v19 = vadd.f32 %v699_v18, %v611_v16 }
 0x263   : > { %v1325_v20 = vpop.f32.mrf.mxu1 }
 0x264   : > { %v788_v21 = vpop.f32.mrf.mxu0 }
 0x265   : > { %v792_v22 = vadd.f32 %v788_v21, %v703_v19 }
 0x266   : > { %v1330_v23 = vpop.f32.mrf.mxu0 }
 0x269   : > { %v880_v24 = vpop.f32.mrf.mxu1 }
 0x26a   : > { %v884_v25 = vadd.f32 %v880_v24, %v792_v22 }
 0x26b   : > { %v1335_v26 = vpop.f32.mrf.mxu1 }
 0x26d   : > { %v972_v27 = vpop.f32.mrf.mxu0 }
 0x26e   : > { %v976_v28 = vadd.f32 %v972_v27, %v884_v25 }
 0x26f   : > { %v1340_v29 = vpop.f32.mrf.mxu0 }
 0x270   : > { %v1061_v30 = vpop.f32.mrf.mxu1 }
 0x271   : > { %v1065_v31 = vadd.f32 %v1061_v30, %v976_v28 }
 0x272   : > { %v1345_v32 = vpop.f32.mrf.mxu1 }
 0x275   : > { %v1153_v33 = vpop.f32.mrf.mxu0 }
 0x276   : > { %v1157_v34 = vadd.f32 %v1153_v33, %v1065_v31 }
 0x277   : > { %v1350_v35 = vpop.f32.mrf.mxu0 }
 0x278   : > { %1158 = vst [vmem:[%s1539_s10] sm:$0xff] %v1157_v34 }
 0x279 PF: > { %s15_s22 = sadd.s32 1, %s1448_s22   ;;  %s1669_s18 = smov %s1440_s20 }
 0x27a   : > { %p12_p9 = scmp.ge.s32.totalorder %s15_s22, 6   ;;  %s1670_s19 = smov %s1444_s21 }
 0x27b   : > { %s1671_s20 = smov %s1674_s23  ;;  %s1672_s21 = smov %s1678_s24 }
 0x27c   :  { %14 = sbr.rel (!%p12_p9) target bundleno = 3 (0x3), region = 86 }

</bundles_post_ra>
